<compile_context>
chip_gen: v7x
topology: tpu7x:2x2x1
jax: 0.10.0
libtpu: 0.0.40
codegen_flags: <defaults>
</compile_context>

<pallas_src>
import functools

import jax
import jax.numpy as jnp
from jax.experimental import pallas as pl
from jax.experimental.pallas import tpu as pltpu

IN_DIM, H1, H2, H3, OUT_DIM = 28 * 28, 256, 128, 64, 10

# Padded (lane-dense) dims used inside the kernel.
IN_P = 896     # 7 * 128
H3_P = 128
OUT_P = 128


def _round_up(x, m):
    return ((x + m - 1) // m) * m


def dnn_kernel(x_ref, w1_ref, b1_ref, w2_ref, b2_ref,
               w3_ref, b3_ref, w4_ref, b4_ref, o_ref):
    # Fully fused MLP forward for one batch tile.
    # Matmuls in bf16 (MXU-native on v5e/v6e/v7x) with f32 accumulation;
    # bias add + ReLU in f32 on the VPU.
    x = x_ref[...]                                                      # bf16 (bn, 896)
    h = jnp.dot(x, w1_ref[...], preferred_element_type=jnp.float32) + b1_ref[...]
    h = jnp.maximum(h, 0.0).astype(jnp.bfloat16)
    h = jnp.dot(h, w2_ref[...], preferred_element_type=jnp.float32) + b2_ref[...]
    h = jnp.maximum(h, 0.0).astype(jnp.bfloat16)
    h = jnp.dot(h, w3_ref[...], preferred_element_type=jnp.float32) + b3_ref[...]
    h = jnp.maximum(h, 0.0).astype(jnp.bfloat16)
    out = jnp.dot(h, w4_ref[...], preferred_element_type=jnp.float32) + b4_ref[...]
    o_ref[...] = out.astype(o_ref.dtype)                                # (bn, 128) f32


@functools.partial(jax.jit, static_argnames=("bn",))
def dnn_forward(x, params, *, bn=512):
    """x: (N, 784) or (N, 1, 28, 28)-like; flattened to (N, 784) as in forward().

    bn: batch tile. Default 512 is MXU-M aligned, fits v5e's 16 MiB scoped VMEM,
    and gives many grid steps for pipelining / megacore sharding on v7x.
    """
    x = x.reshape(-1, IN_DIM).astype(jnp.float32)
    N = x.shape[0]

    (w1, b1), (w2, b2), (w3, b3), (w4, b4) = params

    # --- tile / pad sizing (keeps the (8,128) BlockSpec constraint satisfied) ---
    bn_eff = min(bn, _round_up(N, 8))
    bn_eff = _round_up(bn_eff, 8)
    Np = _round_up(N, bn_eff)
    grid = (Np // bn_eff,)

    # --- pad + cast inputs/weights (zero padding does not change the math) ---
    xp = jnp.zeros((Np, IN_P), jnp.bfloat16).at[:N, :IN_DIM].set(
        x.astype(jnp.bfloat16))

    w1p = jnp.zeros((IN_P, H1), jnp.bfloat16).at[:IN_DIM, :].set(
        w1.astype(jnp.bfloat16))
    b1p = b1.reshape(1, H1).astype(jnp.float32)

    w2p = w2.astype(jnp.bfloat16)                                       # (256, 128)
    b2p = b2.reshape(1, H2).astype(jnp.float32)

    w3p = jnp.zeros((H2, H3_P), jnp.bfloat16).at[:, :H3].set(
        w3.astype(jnp.bfloat16))
    b3p = jnp.zeros((1, H3_P), jnp.float32).at[:, :H3].set(
        b3.reshape(1, H3).astype(jnp.float32))

    w4p = jnp.zeros((H3_P, OUT_P), jnp.bfloat16).at[:H3, :OUT_DIM].set(
        w4.astype(jnp.bfloat16))
    b4p = jnp.zeros((1, OUT_P), jnp.float32).at[:, :OUT_DIM].set(
        b4.reshape(1, OUT_DIM).astype(jnp.float32))

    # Weights / biases replicated across the batch-tile grid (constant
    # index_map -> no re-DMA per step).
    def rep(shape):
        return pl.BlockSpec(shape, lambda i: (0, 0))

    flops = 2 * Np * (IN_P * H1 + H1 * H2 + H2 * H3_P + H3_P * OUT_P)
    bytes_accessed = (
        Np * IN_P * 2                                                   # x (bf16)
        + (IN_P * H1 + H1 * H2 + H2 * H3_P + H3_P * OUT_P) * 2          # weights (bf16)
        + (H1 + H2 + H3_P + OUT_P) * 4                                  # biases (f32)
        + Np * OUT_P * 4)                                               # output (f32)

    out_padded = pl.pallas_call(
        dnn_kernel,
        out_shape=jax.ShapeDtypeStruct((Np, OUT_P), jnp.float32),
        grid_spec=pltpu.PrefetchScalarGridSpec(
            num_scalar_prefetch=0,
            grid=grid,
            in_specs=[
                pl.BlockSpec((bn_eff, IN_P), lambda i: (i, 0)),         # x tile
                rep((IN_P, H1)),  rep((1, H1)),
                rep((H1, H2)),    rep((1, H2)),
                rep((H2, H3_P)),  rep((1, H3_P)),
                rep((H3_P, OUT_P)), rep((1, OUT_P)),
            ],
            out_specs=pl.BlockSpec((bn_eff, OUT_P), lambda i: (i, 0)),
        ),
        compiler_params=pltpu.CompilerParams(
            dimension_semantics=("parallel",)),
        cost_estimate=pl.CostEstimate(
            flops=flops, transcendentals=0, bytes_accessed=bytes_accessed),
    )(xp, w1p, b1p, w2p, b2p, w3p, b3p, w4p, b4p)

    return out_padded[:N, :OUT_DIM]


def init_params(key):
    """Deterministic init mirroring the nn.Linear shapes of DNN.__init__.

    Weights stored (in, out) so y = x @ W + b == PyTorch's x @ W.T + b.
    """
    dims = [IN_DIM, H1, H2, H3, OUT_DIM]
    params = []
    for idx, (fan_in, fan_out) in enumerate(zip(dims[:-1], dims[1:])):
        kw, kb, key = jax.random.split(jax.random.fold_in(key, idx), 3)
        bound = 1.0 / jnp.sqrt(fan_in)  # PyTorch default uniform(-1/sqrt(in), 1/sqrt(in))
        w = jax.random.uniform(kw, (fan_in, fan_out), jnp.float32, -bound, bound)
        b = jax.random.uniform(kb, (1, fan_out), jnp.float32, -bound, bound)
        params.append((w, b))
    return params


def dnn_reference(x, params):
    """Pure f32 reference (matches the PyTorch module semantics)."""
    x = x.reshape(-1, IN_DIM)
    (w1, b1), (w2, b2), (w3, b3), (w4, b4) = params
    h = jnp.maximum(x @ w1 + b1, 0.0)
    h = jnp.maximum(h @ w2 + b2, 0.0)
    h = jnp.maximum(h @ w3 + b3, 0.0)
    return h @ w4 + b4


if __name__ == "__main__":
    key = jax.random.PRNGKey(0)
    kx, kp = jax.random.split(key)

    # MNIST-like input, small batch (the forward view(-1, 784) handles NCHW).
    x = jax.random.normal(kx, (8, 1, 28, 28), jnp.float32)
    params = init_params(kp)

    out = dnn_forward(x, params)
    out = jax.block_until_ready(out)

    ref = dnn_reference(x, params)
    assert out.shape == (8, OUT_DIM), out.shape
    # bf16 matmuls with f32 accumulation: loose tolerance vs. the pure-f32 ref.
    assert jnp.allclose(out, ref, atol=5e-2, rtol=5e-2), "mismatch vs reference"

    print("KERNEL_OK")
</pallas_src>

<mosaic_0001>
module attributes {stable_mosaic.version = 11 : i64} {
  func.func @dnn_kernel(%arg0: i32, %arg1: memref<8x896xbf16, #tpu.memory_space<vmem>>, %arg2: memref<896x256xbf16, #tpu.memory_space<vmem>>, %arg3: memref<1x256xf32, #tpu.memory_space<vmem>>, %arg4: memref<256x128xbf16, #tpu.memory_space<vmem>>, %arg5: memref<1x128xf32, #tpu.memory_space<vmem>>, %arg6: memref<128x128xbf16, #tpu.memory_space<vmem>>, %arg7: memref<1x128xf32, #tpu.memory_space<vmem>>, %arg8: memref<128x128xbf16, #tpu.memory_space<vmem>>, %arg9: memref<1x128xf32, #tpu.memory_space<vmem>>, %arg10: memref<8x128xf32, #tpu.memory_space<vmem>>) attributes {dimension_semantics = [#tpu.dimension_semantics<parallel>], iteration_bounds = array<i64: 1>, scalar_prefetch = 0 : i64, scratch_operands = 0 : i64, tpu.core_type = #tpu.core_type<tc>, window_params = [{transform_indices = @transform_0, window_bounds = array<i64: 8, 896>}, {pipeline_mode = #tpu.pipeline_mode<synchronous>, transform_indices = @transform_1, window_bounds = array<i64: 896, 256>}, {pipeline_mode = #tpu.pipeline_mode<synchronous>, transform_indices = @transform_2, window_bounds = array<i64: 1, 256>}, {pipeline_mode = #tpu.pipeline_mode<synchronous>, transform_indices = @transform_3, window_bounds = array<i64: 256, 128>}, {pipeline_mode = #tpu.pipeline_mode<synchronous>, transform_indices = @transform_4, window_bounds = array<i64: 1, 128>}, {pipeline_mode = #tpu.pipeline_mode<synchronous>, transform_indices = @transform_5, window_bounds = array<i64: 128, 128>}, {pipeline_mode = #tpu.pipeline_mode<synchronous>, transform_indices = @transform_6, window_bounds = array<i64: 1, 128>}, {pipeline_mode = #tpu.pipeline_mode<synchronous>, transform_indices = @transform_7, window_bounds = array<i64: 128, 128>}, {pipeline_mode = #tpu.pipeline_mode<synchronous>, transform_indices = @transform_8, window_bounds = array<i64: 1, 128>}, {transform_indices = @transform_9, window_bounds = array<i64: 8, 128>}]} {
    %c0 = arith.constant 0 : index
    %c0_0 = arith.constant 0 : index
    %0 = vector.load %arg1[%c0, %c0_0] : memref<8x896xbf16, #tpu.memory_space<vmem>>, vector<8x896xbf16>
    %c0_1 = arith.constant 0 : index
    %c0_2 = arith.constant 0 : index
    %1 = vector.load %arg2[%c0_1, %c0_2] : memref<896x256xbf16, #tpu.memory_space<vmem>>, vector<896x256xbf16>
    %cst = arith.constant dense<0.000000e+00> : vector<8x256xf32>
    %2 = tpu.matmul %0, %1, %cst {dimension_numbers = #tpu.dot_dimension_numbers<[1], [0], [0], [1], [0, 0, 1, 1], [], []>} : vector<8x896xbf16>, vector<896x256xbf16>, vector<8x256xf32> -> vector<8x256xf32>
    %c0_3 = arith.constant 0 : index
    %c0_4 = arith.constant 0 : index
    %3 = vector.load %arg3[%c0_3, %c0_4] : memref<1x256xf32, #tpu.memory_space<vmem>>, vector<1x256xf32>
    %4 = vector.broadcast %3 : vector<1x256xf32> to vector<8x256xf32>
    %5 = arith.addf %2, %4 : vector<8x256xf32>
    %cst_5 = arith.constant 0.000000e+00 : f32
    %6 = vector.broadcast %cst_5 : f32 to vector<8x256xf32>
    %7 = arith.maximumf %5, %6 : vector<8x256xf32>
    %8 = arith.truncf %7 : vector<8x256xf32> to vector<8x256xbf16>
    %c0_6 = arith.constant 0 : index
    %c0_7 = arith.constant 0 : index
    %9 = vector.load %arg4[%c0_6, %c0_7] : memref<256x128xbf16, #tpu.memory_space<vmem>>, vector<256x128xbf16>
    %cst_8 = arith.constant dense<0.000000e+00> : vector<8x128xf32>
    %10 = tpu.matmul %8, %9, %cst_8 {dimension_numbers = #tpu.dot_dimension_numbers<[1], [0], [0], [1], [0, 0, 1, 1], [], []>} : vector<8x256xbf16>, vector<256x128xbf16>, vector<8x128xf32> -> vector<8x128xf32>
    %c0_9 = arith.constant 0 : index
    %c0_10 = arith.constant 0 : index
    %11 = vector.load %arg5[%c0_9, %c0_10] : memref<1x128xf32, #tpu.memory_space<vmem>>, vector<1x128xf32>
    %12 = vector.broadcast %11 : vector<1x128xf32> to vector<8x128xf32>
    %13 = arith.addf %10, %12 : vector<8x128xf32>
    %cst_11 = arith.constant 0.000000e+00 : f32
    %14 = vector.broadcast %cst_11 : f32 to vector<8x128xf32>
    %15 = arith.maximumf %13, %14 : vector<8x128xf32>
    %16 = arith.truncf %15 : vector<8x128xf32> to vector<8x128xbf16>
    %c0_12 = arith.constant 0 : index
    %c0_13 = arith.constant 0 : index
    %17 = vector.load %arg6[%c0_12, %c0_13] : memref<128x128xbf16, #tpu.memory_space<vmem>>, vector<128x128xbf16>
    %cst_14 = arith.constant dense<0.000000e+00> : vector<8x128xf32>
    %18 = tpu.matmul %16, %17, %cst_14 {dimension_numbers = #tpu.dot_dimension_numbers<[1], [0], [0], [1], [0, 0, 1, 1], [], []>} : vector<8x128xbf16>, vector<128x128xbf16>, vector<8x128xf32> -> vector<8x128xf32>
    %c0_15 = arith.constant 0 : index
    %c0_16 = arith.constant 0 : index
    %19 = vector.load %arg7[%c0_15, %c0_16] : memref<1x128xf32, #tpu.memory_space<vmem>>, vector<1x128xf32>
    %20 = vector.broadcast %19 : vector<1x128xf32> to vector<8x128xf32>
    %21 = arith.addf %18, %20 : vector<8x128xf32>
    %cst_17 = arith.constant 0.000000e+00 : f32
    %22 = vector.broadcast %cst_17 : f32 to vector<8x128xf32>
    %23 = arith.maximumf %21, %22 : vector<8x128xf32>
    %24 = arith.truncf %23 : vector<8x128xf32> to vector<8x128xbf16>
    %c0_18 = arith.constant 0 : index
    %c0_19 = arith.constant 0 : index
    %25 = vector.load %arg8[%c0_18, %c0_19] : memref<128x128xbf16, #tpu.memory_space<vmem>>, vector<128x128xbf16>
    %cst_20 = arith.constant dense<0.000000e+00> : vector<8x128xf32>
    %26 = tpu.matmul %24, %25, %cst_20 {dimension_numbers = #tpu.dot_dimension_numbers<[1], [0], [0], [1], [0, 0, 1, 1], [], []>} : vector<8x128xbf16>, vector<128x128xbf16>, vector<8x128xf32> -> vector<8x128xf32>
    %c0_21 = arith.constant 0 : index
    %c0_22 = arith.constant 0 : index
    %27 = vector.load %arg9[%c0_21, %c0_22] : memref<1x128xf32, #tpu.memory_space<vmem>>, vector<1x128xf32>
    %28 = vector.broadcast %27 : vector<1x128xf32> to vector<8x128xf32>
    %29 = arith.addf %26, %28 : vector<8x128xf32>
    %c0_23 = arith.constant 0 : index
    %c0_24 = arith.constant 0 : index
    %30 = vector.load %arg10[%c0_23, %c0_24] : memref<8x128xf32, #tpu.memory_space<vmem>>, vector<8x128xf32>
    tpu.vector_store %arg10[%c0_23, %c0_24], %29 {strides = array<i32>} : memref<8x128xf32, #tpu.memory_space<vmem>>, vector<8x128xf32>,
    return
  }
  func.func @transform_0(%arg0: i32) -> (i32, i32) {
    %c0_i32 = arith.constant 0 : i32
    %c0_i32_0 = arith.constant 0 : i32
    return %arg0, %c0_i32 : i32, i32
  }
  func.func @transform_1(%arg0: i32) -> (i32, i32) {
    %c0_i32 = arith.constant 0 : i32
    %c0_i32_0 = arith.constant 0 : i32
    %c0_i32_1 = arith.constant 0 : i32
    return %c0_i32, %c0_i32_0 : i32, i32
  }
  func.func @transform_2(%arg0: i32) -> (i32, i32) {
    %c0_i32 = arith.constant 0 : i32
    %c0_i32_0 = arith.constant 0 : i32
    %c0_i32_1 = arith.constant 0 : i32
    return %c0_i32, %c0_i32_0 : i32, i32
  }
  func.func @transform_3(%arg0: i32) -> (i32, i32) {
    %c0_i32 = arith.constant 0 : i32
    %c0_i32_0 = arith.constant 0 : i32
    %c0_i32_1 = arith.constant 0 : i32
    return %c0_i32, %c0_i32_0 : i32, i32
  }
  func.func @transform_4(%arg0: i32) -> (i32, i32) {
    %c0_i32 = arith.constant 0 : i32
    %c0_i32_0 = arith.constant 0 : i32
    %c0_i32_1 = arith.constant 0 : i32
    return %c0_i32, %c0_i32_0 : i32, i32
  }
  func.func @transform_5(%arg0: i32) -> (i32, i32) {
    %c0_i32 = arith.constant 0 : i32
    %c0_i32_0 = arith.constant 0 : i32
    %c0_i32_1 = arith.constant 0 : i32
    return %c0_i32, %c0_i32_0 : i32, i32
  }
  func.func @transform_6(%arg0: i32) -> (i32, i32) {
    %c0_i32 = arith.constant 0 : i32
    %c0_i32_0 = arith.constant 0 : i32
    %c0_i32_1 = arith.constant 0 : i32
    return %c0_i32, %c0_i32_0 : i32, i32
  }
  func.func @transform_7(%arg0: i32) -> (i32, i32) {
    %c0_i32 = arith.constant 0 : i32
    %c0_i32_0 = arith.constant 0 : i32
    %c0_i32_1 = arith.constant 0 : i32
    return %c0_i32, %c0_i32_0 : i32, i32
  }
  func.func @transform_8(%arg0: i32) -> (i32, i32) {
    %c0_i32 = arith.constant 0 : i32
    %c0_i32_0 = arith.constant 0 : i32
    %c0_i32_1 = arith.constant 0 : i32
    return %c0_i32, %c0_i32_0 : i32, i32
  }
  func.func @transform_9(%arg0: i32) -> (i32, i32) {
    %c0_i32 = arith.constant 0 : i32
    %c0_i32_0 = arith.constant 0 : i32
    return %arg0, %c0_i32 : i32, i32
  }
}

</mosaic_0001>

<bundles_post_ra>
// kernel: dnn_forward.1
= control target key start
LH: loop header
LB: loop body
LE: loop exit
PB: predicated region body
PF: predicated region fallthrough
CT: control target
= control target key end

     0   :  { %s2364_s0 = inlined_call_operand.vmem [shape: bf16[8,896], index: 0, kind: input, shape index: {}]   ;;  %s2365_s1 = inlined_call_operand.vmem [shape: bf16[896,256], index: 1, kind: input, shape index: {}]   ;;  %s2366_s2 = inlined_call_operand.vmem [shape: f32[1,256], index: 2, kind: input, shape index: {}]   ;;  %s2367_s3 = inlined_call_operand.vmem [shape: bf16[256,128], index: 3, kind: input, shape index: {}]   ;;  %s2368_s4 = inlined_call_operand.vmem [shape: f32[1,128], index: 4, kind: input, shape index: {}]   ;;  %s2369_s5 = inlined_call_operand.vmem [shape: bf16[128,128], index: 5, kind: input, shape index: {}]   ;;  %s2370_s6 = inlined_call_operand.vmem [shape: f32[1,128], index: 6, kind: input, shape index: {}]   ;;  %s2371_s7 = inlined_call_operand.vmem [shape: bf16[128,128], index: 7, kind: input, shape index: {}]   ;;  %s2372_s8 = inlined_call_operand.vmem [shape: f32[1,128], index: 8, kind: input, shape index: {}]   ;;  %s2373_s9 = inlined_call_operand.hbm [shape: f32[8,128], index: 9, kind: output, shape index: {}]  }
   0x1   :  { %v1581_v0 = vld [vmem:[%s2365_s1 + $0x104] ss:$8 sps:$4 sm:$0xff]   ;;  %v1583_v1 = vld [vmem:[%s2365_s1 + $0x100] ss:$8 sps:$4 sm:$0xff]   ;;  %v1584_v2 = vld [vmem:[%s2365_s1 + $0x114] ss:$8 sps:$4 sm:$0xff]  }
   0x2   :  { %788 = vmatprep.subr.bf16.mxu0 %v1581_v0  ;;  %v1586_v3 = vld [vmem:[%s2365_s1 + $0x110] ss:$8 sps:$4 sm:$0xff]   ;;  %v1587_v4 = vld [vmem:[%s2365_s1 + $0x124] ss:$8 sps:$4 sm:$0xff]   ;;  %v1589_v5 = vld [vmem:[%s2365_s1 + $0x120] ss:$8 sps:$4 sm:$0xff]  }
   0x3   :  { %789 = vmatpush1.bf16.msra.mxu0 %v1583_v1  ;;  %v1590_v6 = vld [vmem:[%s2365_s1 + $0x134] ss:$8 sps:$4 sm:$0xff]   ;;  %v1592_v7 = vld [vmem:[%s2365_s1 + $0x130] ss:$8 sps:$4 sm:$0xff]   ;;  %v1593_v8 = vld [vmem:[%s2365_s1 + $0x144] ss:$8 sps:$4 sm:$0xff]  }
   0x4   :  { %790 = vmatprep.subr.bf16.mxu0 %v1584_v2  ;;  %v1595_v9 = vld [vmem:[%s2365_s1 + $0x140] ss:$8 sps:$4 sm:$0xff]   ;;  %v1596_v10 = vld [vmem:[%s2365_s1 + $0x154] ss:$8 sps:$4 sm:$0xff]   ;;  %v1598_v11 = vld [vmem:[%s2365_s1 + $0x150] ss:$8 sps:$4 sm:$0xff]  }
   0x5   :  { %v1599_v12 = vld [vmem:[%s2365_s1 + $0x164] ss:$8 sps:$4 sm:$0xff]   ;;  %v1601_v15 = vld [vmem:[%s2365_s1 + $0x160] ss:$8 sps:$4 sm:$0xff]   ;;  %v1602_v16 = vld [vmem:[%s2365_s1 + $0x174] ss:$8 sps:$4 sm:$0xff]  }
   0x6   :  { %v1908_v13 = vld [vmem:[%s2364_s0 + $0x8] sm:$0xff]  ;;  %v1604_v17 = vld [vmem:[%s2365_s1 + $0x170] ss:$8 sps:$4 sm:$0xff]   ;;  %v1608_v20 = vld [vmem:[%s2365_s1 + $0x194] ss:$8 sps:$4 sm:$0xff]  }
   0x7   :  { %791 = vmatpush1.bf16.msra.mxu0 %v1586_v3  ;;  %v1334_v14 = vcombine.high %v1908_v13, %v1908_v13  ;;  %v1605_v18 = vld [vmem:[%s2365_s1 + $0x184] ss:$8 sps:$4 sm:$0xff]   ;;  %v1607_v19 = vld [vmem:[%s2365_s1 + $0x180] ss:$8 sps:$4 sm:$0xff]   ;;  %v1658_v23 = vld [vmem:[%s2365_s1 + $0x14] ss:$8 sps:$4 sm:$0xff]   ;;  %v1333_v54 = vcombine.low %v1908_v13, %v1908_v13 }
   0x8   :  { %792 = vmatprep.subr.bf16.mxu0 %v1587_v4  ;;  %v1652_v21 = vld [vmem:[%s2365_s1 + $0x4] ss:$8 sps:$4 sm:$0xff]   ;;  %v1654_v22 = vld [vmem:[%s2365_s1] ss:$8 sps:$4 sm:$0xff]   ;;  %v1660_v24 = vld [vmem:[%s2365_s1 + $0x10] ss:$8 sps:$4 sm:$0xff]  }
   0x9   :  { %820 = vmatprep.mubr.bf16.mxu0 %v1334_v14  ;;  %747 = vmatprep.subr.bf16.mxu1 %v1652_v21  ;;  %v1610_v25 = vld [vmem:[%s2365_s1 + $0x190] ss:$8 sps:$4 sm:$0xff]   ;;  %v1611_v26 = vld [vmem:[%s2365_s1 + $0x1a4] ss:$8 sps:$4 sm:$0xff]   ;;  %v1613_v28 = vld [vmem:[%s2365_s1 + $0x1a0] ss:$8 sps:$4 sm:$0xff]  }
   0xa   :  { %748 = vmatpush1.bf16.msra.mxu1 %v1654_v22  ;;  %v1664_v27 = vld [vmem:[%s2365_s1 + $0x24] ss:$8 sps:$4 sm:$0xff]   ;;  %v1666_v29 = vld [vmem:[%s2365_s1 + $0x20] ss:$8 sps:$4 sm:$0xff]   ;;  %v1670_v30 = vld [vmem:[%s2365_s1 + $0x34] ss:$8 sps:$4 sm:$0xff]  }
   0xb   :  { %793 = vmatpush1.bf16.msra.mxu0 %v1589_v5  ;;  %749 = vmatprep.subr.bf16.mxu1 %v1658_v23  ;;  %v1614_v31 = vld [vmem:[%s2365_s1 + $0x1b4] ss:$8 sps:$4 sm:$0xff]   ;;  %v1616_v32 = vld [vmem:[%s2365_s1 + $0x1b0] ss:$8 sps:$4 sm:$0xff]   ;;  %v1676_v34 = vld [vmem:[%s2365_s1 + $0x44] ss:$8 sps:$4 sm:$0xff]  }
   0xc   :  { %794 = vmatprep.subr.bf16.mxu0 %v1590_v6  ;;  %v1672_v33 = vld [vmem:[%s2365_s1 + $0x30] ss:$8 sps:$4 sm:$0xff]   ;;  %v1617_v35 = vld [vmem:[%s2365_s1 + $0x1c4] ss:$8 sps:$4 sm:$0xff]   ;;  %v1619_v36 = vld [vmem:[%s2365_s1 + $0x1c0] ss:$8 sps:$4 sm:$0xff]  }
   0xd   :  { %v1678_v37 = vld [vmem:[%s2365_s1 + $0x40] ss:$8 sps:$4 sm:$0xff]   ;;  %v1682_v38 = vld [vmem:[%s2365_s1 + $0x54] ss:$8 sps:$4 sm:$0xff]   ;;  %v1622_v40 = vld [vmem:[%s2365_s1 + $0x1d0] ss:$8 sps:$4 sm:$0xff]  }
   0xe   :  { %750 = vmatpush1.bf16.msra.mxu1 %v1660_v24  ;;  %v1620_v39 = vld [vmem:[%s2365_s1 + $0x1d4] ss:$8 sps:$4 sm:$0xff]   ;;  %v1684_v41 = vld [vmem:[%s2365_s1 + $0x50] ss:$8 sps:$4 sm:$0xff]   ;;  %v1688_v42 = vld [vmem:[%s2365_s1 + $0x64] ss:$8 sps:$4 sm:$0xff]  }
   0xf   :  { %795 = vmatpush1.bf16.msra.mxu0 %v1592_v7  ;;  %751 = vmatprep.subr.bf16.mxu1 %v1664_v27  ;;  %v1623_v43 = vld [vmem:[%s2365_s1 + $0x1e4] ss:$8 sps:$4 sm:$0xff]   ;;  %v1625_v44 = vld [vmem:[%s2365_s1 + $0x1e0] ss:$8 sps:$4 sm:$0xff]   ;;  %v1694_v46 = vld [vmem:[%s2365_s1 + $0x74] ss:$8 sps:$4 sm:$0xff]  }
  0x10   :  { %796 = vmatprep.subr.bf16.mxu0 %v1593_v8  ;;  %v1690_v45 = vld [vmem:[%s2365_s1 + $0x60] ss:$8 sps:$4 sm:$0xff]   ;;  %v1626_v47 = vld [vmem:[%s2365_s1 + $0x1f4] ss:$8 sps:$4 sm:$0xff]   ;;  %v1628_v48 = vld [vmem:[%s2365_s1 + $0x1f0] ss:$8 sps:$4 sm:$0xff]  }
  0x11   :  { %v1696_v49 = vld [vmem:[%s2365_s1 + $0x70] ss:$8 sps:$4 sm:$0xff]   ;;  %v1700_v50 = vld [vmem:[%s2365_s1 + $0x84] ss:$8 sps:$4 sm:$0xff]   ;;  %v1631_v52 = vld [vmem:[%s2365_s1 + $0x200] ss:$8 sps:$4 sm:$0xff]  }
  0x12   :  { %752 = vmatpush1.bf16.msra.mxu1 %v1666_v29  ;;  %v1633_v51 = vld [vmem:[%s2365_s1 + $0x204] ss:$8 sps:$4 sm:$0xff]   ;;  %v2029_v53 = vld [vmem:[%s2364_s0 + $0x10] sm:$0xff]  ;;  %v1702_v55 = vld [vmem:[%s2365_s1 + $0x80] ss:$8 sps:$4 sm:$0xff]  }
  0x13   :  { %797 = vmatpush1.bf16.msra.mxu0 %v1595_v9  ;;  %753 = vmatprep.subr.bf16.mxu1 %v1670_v30  ;;  %v1706_v56 = vld [vmem:[%s2365_s1 + $0x94] ss:$8 sps:$4 sm:$0xff]   ;;  %v1336_v58 = vcombine.high %v2029_v53, %v2029_v53  ;;  %v1634_v59 = vld [vmem:[%s2365_s1 + $0x210] ss:$8 sps:$4 sm:$0xff]   ;;  %v1714_v61 = vld [vmem:[%s2365_s1 + $0xa4] ss:$8 sps:$4 sm:$0xff]  }
  0x14   :  { %798 = vmatprep.subr.bf16.mxu0 %v1596_v10  ;;  %v1636_v57 = vld [vmem:[%s2365_s1 + $0x214] ss:$8 sps:$4 sm:$0xff]   ;;  %v1708_v60 = vld [vmem:[%s2365_s1 + $0x90] ss:$8 sps:$4 sm:$0xff]   ;;  %v1639_v62 = vld [vmem:[%s2365_s1 + $0x224] ss:$8 sps:$4 sm:$0xff]  }
  0x15   :  { %v1637_v63 = vld [vmem:[%s2365_s1 + $0x220] ss:$8 sps:$4 sm:$0xff]   ;;  %v1720_v1 = vld [vmem:[%s2365_s1 + $0xb4] ss:$8 sps:$4 sm:$0xff]   ;;  %v1722_v3 = vld [vmem:[%s2365_s1 + $0xb0] ss:$8 sps:$4 sm:$0xff]  }
  0x16   :  { %754 = vmatpush1.bf16.msra.mxu1 %v1672_v33  ;;  %v1716_v0 = vld [vmem:[%s2365_s1 + $0xa0] ss:$8 sps:$4 sm:$0xff]   ;;  %v1642_v2 = vld [vmem:[%s2365_s1 + $0x234] ss:$8 sps:$4 sm:$0xff]   ;;  %v1640_v5 = vld [vmem:[%s2365_s1 + $0x230] ss:$8 sps:$4 sm:$0xff]  }
  0x17   :  { %799 = vmatpush1.bf16.msra.mxu0 %v1598_v11  ;;  %755 = vmatprep.subr.bf16.mxu1 %v1676_v34  ;;  %v34_v4 = vld [vmem:[%s2364_s0] sm:$0xff]  ;;  %v1732_v11 = vld [vmem:[%s2365_s1 + $0xd4] ss:$8 sps:$4 sm:$0xff]   ;;  %v1646_v13 = vld [vmem:[%s2365_s1 + $0x250] ss:$8 sps:$4 sm:$0xff]  }
  0x18   :  { %800 = vmatprep.subr.bf16.mxu0 %v1599_v12  ;;  %v1726_v6 = vld [vmem:[%s2365_s1 + $0xc4] ss:$8 sps:$4 sm:$0xff]   ;;  %v1332_v7 = vcombine.high %v34_v4, %v34_v4  ;;  %v1643_v9 = vld [vmem:[%s2365_s1 + $0x240] ss:$8 sps:$4 sm:$0xff]   ;;  %v1648_v12 = vld [vmem:[%s2365_s1 + $0x254] ss:$8 sps:$4 sm:$0xff]   ;;  %v1331_v27 = vcombine.low %v34_v4, %v34_v4 }
  0x19   :  { %v1645_v8 = vld [vmem:[%s2365_s1 + $0x244] ss:$8 sps:$4 sm:$0xff]   ;;  %v1728_v10 = vld [vmem:[%s2365_s1 + $0xc0] ss:$8 sps:$4 sm:$0xff]   ;;  %v1734_v14 = vld [vmem:[%s2365_s1 + $0xd0] ss:$8 sps:$4 sm:$0xff]  }
  0x1a   :  { %756 = vmatpush1.bf16.msra.mxu1 %v1678_v37  ;;  %779 = vmatprep.mubr.bf16.mxu1 %v1332_v7  ;;  %v1746_v21 = vld [vmem:[%s2365_s1 + $0xf0] ss:$8 sps:$4 sm:$0xff]   ;;  %v1756_v23 = vld [vmem:[%s2367_s3 + $0x40] sm:$0xff]   ;;  %v1669_v29 = vld [vmem:[%s2365_s1 + $0x294] ss:$8 sps:$4 sm:$0xff]  }
  0x1b   :  { %801 = vmatpush1.bf16.msra.mxu0 %v1601_v15  ;;  %757 = vmatprep.subr.bf16.mxu1 %v1682_v38  ;;  %v1738_v15 = vld [vmem:[%s2365_s1 + $0xe4] ss:$8 sps:$4 sm:$0xff]   ;;  %v1655_v22 = vld [vmem:[%s2365_s1 + $0x270] ss:$8 sps:$4 sm:$0xff]  }
  0x1c   :  { %802 = vmatprep.subr.bf16.mxu0 %v1602_v16  ;;  %v1651_v16 = vld [vmem:[%s2365_s1 + $0x264] ss:$8 sps:$4 sm:$0xff]  }
  0x1d   :  { %v1663_v24 = vld [vmem:[%s2365_s1 + $0x284] ss:$8 sps:$4 sm:$0xff]  }
  0x1e   :  { %758 = vmatpush1.bf16.msra.mxu1 %v1684_v41  ;;  %v1759_v30 = vld [vmem:[%s2367_s3 + $0x8] sm:$0xff]  }
  0x1f   :  { %803 = vmatpush1.bf16.msra.mxu0 %v1604_v17  ;;  %759 = vmatprep.subr.bf16.mxu1 %v1688_v42  ;;  %v1649_v17 = vld [vmem:[%s2365_s1 + $0x260] ss:$8 sps:$4 sm:$0xff]   ;;  %v1675_v33 = vld [vmem:[%s2365_s1 + $0x2a4] ss:$8 sps:$4 sm:$0xff]  }
  0x20   :  { %804 = vmatprep.subr.bf16.mxu0 %v1605_v18  ;;  %v1657_v18 = vld [vmem:[%s2365_s1 + $0x274] ss:$8 sps:$4 sm:$0xff]  }
  0x22   :  { %760 = vmatpush1.bf16.msra.mxu1 %v1690_v45 }
  0x23   :  { %805 = vmatpush1.bf16.msra.mxu0 %v1607_v19  ;;  %761 = vmatprep.subr.bf16.mxu1 %v1694_v46  ;;  %v1740_v19 = vld [vmem:[%s2365_s1 + $0xe0] ss:$8 sps:$4 sm:$0xff]  }
  0x24   :  { %806 = vmatprep.subr.bf16.mxu0 %v1608_v20  ;;  %v1744_v20 = vld [vmem:[%s2365_s1 + $0xf4] ss:$8 sps:$4 sm:$0xff]  }
  0x26   :  { %762 = vmatpush1.bf16.msra.mxu1 %v1696_v49 }
  0x27   :  { %807 = vmatpush1.bf16.msra.mxu0 %v1610_v25  ;;  %763 = vmatprep.subr.bf16.mxu1 %v1700_v50  ;;  %v1757_v25 = vld [vmem:[%s2367_s3] sm:$0xff]  }
  0x28   :  { %808 = vmatprep.subr.bf16.mxu0 %v1611_v26  ;;  %v1661_v26 = vld [vmem:[%s2365_s1 + $0x280] ss:$8 sps:$4 sm:$0xff]  }
  0x2a   :  { %764 = vmatpush1.bf16.msra.mxu1 %v1702_v55 }
  0x2b   :  { %809 = vmatpush1.bf16.msra.mxu0 %v1613_v28  ;;  %765 = vmatprep.subr.bf16.mxu1 %v1706_v56  ;;  %v1758_v28 = vld [vmem:[%s2367_s3 + $0x48] sm:$0xff]  }
  0x2c   :  { %810 = vmatprep.subr.bf16.mxu0 %v1614_v31  ;;  %v1667_v31 = vld [vmem:[%s2365_s1 + $0x290] ss:$8 sps:$4 sm:$0xff]  }
  0x2e   :  { %766 = vmatpush1.bf16.msra.mxu1 %v1708_v60 }
  0x2f   :  { %811 = vmatpush1.bf16.msra.mxu0 %v1616_v32  ;;  %767 = vmatprep.subr.bf16.mxu1 %v1714_v61  ;;  %v1760_v32 = vld [vmem:[%s2367_s3 + $0x50] sm:$0xff]  }
  0x30   :  { %812 = vmatprep.subr.bf16.mxu0 %v1617_v35 }
  0x32   :  { %768 = vmatpush1.bf16.msra.mxu1 %v1716_v0 }
  0x33   :  { %813 = vmatpush1.bf16.msra.mxu0 %v1619_v36  ;;  %769 = vmatprep.subr.bf16.mxu1 %v1720_v1 }
  0x34   :  { %814 = vmatprep.subr.bf16.mxu0 %v1620_v39 }
  0x36   :  { %770 = vmatpush1.bf16.msra.mxu1 %v1722_v3 }
  0x37   :  { %815 = vmatpush1.bf16.msra.mxu0 %v1622_v40  ;;  %771 = vmatprep.subr.bf16.mxu1 %v1726_v6 }
  0x38   :  { %816 = vmatprep.subr.bf16.mxu0 %v1623_v43 }
  0x3a   :  { %772 = vmatpush1.bf16.msra.mxu1 %v1728_v10 }
  0x3b   :  { %817 = vmatpush1.bf16.msra.mxu0 %v1625_v44  ;;  %773 = vmatprep.subr.bf16.mxu1 %v1732_v11 }
  0x3c   :  { %818 = vmatprep.subr.bf16.mxu0 %v1626_v47 }
  0x3e   :  { %774 = vmatpush1.bf16.msra.mxu1 %v1734_v14 }
  0x3f   :  { %819 = vmatpush1.bf16.msra.mxu0 %v1628_v48  ;;  %775 = vmatprep.subr.bf16.mxu1 %v1738_v15 }
  0x40   :  { %829 = vmatprep.subr.bf16.mxu0 %v1633_v51 }
  0x42   :  { %821 = vmatmul.mubr.bf16.vlgmr.msra.gmra.mrb[0].mxu0 %v1333_v54  ;;  %776 = vmatpush1.bf16.msra.mxu1 %v1740_v19 }
  0x43   :  { %830 = vmatpush1.bf16.msra.mxu0 %v1631_v52  ;;  %861 = vmatprep.mubr.bf16.mxu0 %v1336_v58 }
  0x44   :  { %831 = vmatprep.subr.bf16.mxu0 %v1636_v57  ;;  %777 = vmatprep.subr.bf16.mxu1 %v1744_v20 }
  0x46   :  { %778 = vmatpush1.bf16.msra.mxu1 %v1746_v21 }
  0x47   :  { %832 = vmatpush1.bf16.msra.mxu0 %v1634_v59  ;;  %1485 = vmatprep.subr.bf16.mxu1 %v1756_v23 }
  0x48   :  { %833 = vmatprep.subr.bf16.mxu0 %v1639_v62 }
  0x49   :  { %780 = vmatmul.mubr.bf16.vlgmr.msra.gmra.mrb[0].mxu1 %v1331_v27 }
  0x4a   :  { %1486 = vmatpush3.bf16.msra.mxu1 %v1757_v25 }
  0x4b   :  { %834 = vmatpush1.bf16.msra.mxu0 %v1637_v63  ;;  %1487 = vmatprep.subr.bf16.mxu1 %v1758_v28 }
  0x4c   :  { %835 = vmatprep.subr.bf16.mxu0 %v1642_v2 }
  0x4f   :  { %836 = vmatpush1.bf16.msra.mxu0 %v1640_v5 }
  0x50   :  { %837 = vmatprep.subr.bf16.mxu0 %v1645_v8 }
  0x53   :  { %838 = vmatpush1.bf16.msra.mxu0 %v1643_v9 }
  0x54   :  { %839 = vmatprep.subr.bf16.mxu0 %v1648_v12 }
  0x57   :  { %840 = vmatpush1.bf16.msra.mxu0 %v1646_v13 }
  0x58   :  { %841 = vmatprep.subr.bf16.mxu0 %v1651_v16 }
  0x5b   :  { %842 = vmatpush1.bf16.msra.mxu0 %v1649_v17 }
  0x5c   :  { %843 = vmatprep.subr.bf16.mxu0 %v1657_v18 }
  0x5f   :  { %844 = vmatpush1.bf16.msra.mxu0 %v1655_v22 }
  0x60   :  { %845 = vmatprep.subr.bf16.mxu0 %v1663_v24 }
  0x63   :  { %846 = vmatpush1.bf16.msra.mxu0 %v1661_v26 }
  0x64   :  { %847 = vmatprep.subr.bf16.mxu0 %v1669_v29 }
  0x65   :  { %14 = vsyncpa [#allocation3], 0  ;;  %1488 = vmatpush3.bf16.msra.mxu1 %v1759_v30  ;;  %v1761_v34 = vld [vmem:[%s2367_s3 + $0x10] sm:$0xff]   ;;  %v1673_v35 = vld [vmem:[%s2365_s1 + $0x2a0] ss:$8 sps:$4 sm:$0xff]   ;;  %v1335_v51 = vcombine.low %v2029_v53, %v2029_v53  ;;  %v1812_v56 = vmov 0   ;;  %v152_v16 = vlaneseq }
  0x66   :  { %1489 = vmatprep.subr.bf16.mxu1 %v1760_v32  ;;  %v1762_v36 = vld [vmem:[%s2367_s3 + $0x58] sm:$0xff]   ;;  %v1764_v40 = vld [vmem:[%s2367_s3 + $0x60] sm:$0xff]   ;;  %v1766_v5 = vld [vmem:[%s2367_s3 + $0x68] sm:$0xff]   ;;  %v1813_v11 = vmov 0.0   ;;  %vm1814_vm0 = vmmov 0   ;;  %s1815_s30 = smov [#allocation2]  }
  0x67   :  { %848 = vmatpush1.bf16.msra.mxu0 %v1667_v31  ;;  %v1681_v37 = vld [vmem:[%s2365_s1 + $0x2b4] ss:$8 sps:$4 sm:$0xff]   ;;  %v1679_v39 = vld [vmem:[%s2365_s1 + $0x2b0] ss:$8 sps:$4 sm:$0xff]   ;;  %v1687_v41 = vld [vmem:[%s2365_s1 + $0x2c4] ss:$8 sps:$4 sm:$0xff]  }
  0x68   :  { %849 = vmatprep.subr.bf16.mxu0 %v1675_v33  ;;  %v1763_v38 = vld [vmem:[%s2367_s3 + $0x18] sm:$0xff]   ;;  %v1765_v42 = vld [vmem:[%s2367_s3 + $0x20] sm:$0xff]   ;;  %v1767_v6 = vld [vmem:[%s2367_s3 + $0x28] sm:$0xff]   ;;  %v153_v17 = vshrl.u32 %v152_v16, 7  ;;  %s1323_s10 = sshll.u32 %s1815_s30, 4  ;;  %s1324_s10 = int_to_ptr.vmem [resolvable:$true] %s1323_s10 }
  0x69   :  { %1490 = vmatpush3.bf16.msra.mxu1 %v1761_v34  ;;  %v1685_v43 = vld [vmem:[%s2365_s1 + $0x2c0] ss:$8 sps:$4 sm:$0xff]   ;;  %v1693_v44 = vld [vmem:[%s2365_s1 + $0x2d4] ss:$8 sps:$4 sm:$0xff]   ;;  %v1691_v45 = vld [vmem:[%s2365_s1 + $0x2d0] ss:$8 sps:$4 sm:$0xff]   ;;  %p1793_p1 = scmp.lt.s32.totalorder %s1324_s10, %s1324_s10 }
  0x6a   :  { %1491 = vmatprep.subr.bf16.mxu1 %v1762_v36  ;;  %v1699_v46 = vld [vmem:[%s2365_s1 + $0x2e4] ss:$8 sps:$4 sm:$0xff]   ;;  %v1697_v47 = vld [vmem:[%s2365_s1 + $0x2e0] ss:$8 sps:$4 sm:$0xff]   ;;  %v1705_v48 = vld [vmem:[%s2365_s1 + $0x2f4] ss:$8 sps:$4 sm:$0xff]  }
  0x6b   :  { %850 = vmatpush1.bf16.msra.mxu0 %v1673_v35  ;;  %v1703_v49 = vld [vmem:[%s2365_s1 + $0x2f0] ss:$8 sps:$4 sm:$0xff]   ;;  %v1713_v50 = vld [vmem:[%s2365_s1 + $0x304] ss:$8 sps:$4 sm:$0xff]   ;;  %v1711_v52 = vld [vmem:[%s2365_s1 + $0x300] ss:$8 sps:$4 sm:$0xff]  }
  0x6c   :  { %851 = vmatprep.subr.bf16.mxu0 %v1681_v37  ;;  %v1719_v54 = vld [vmem:[%s2365_s1 + $0x314] ss:$8 sps:$4 sm:$0xff]   ;;  %v1717_v55 = vld [vmem:[%s2365_s1 + $0x310] ss:$8 sps:$4 sm:$0xff]   ;;  %v1725_v53 = vld [vmem:[%s2365_s1 + $0x324] ss:$8 sps:$4 sm:$0xff]  }
  0x6d   :  { %1492 = vmatpush3.bf16.msra.mxu1 %v1763_v38  ;;  %v1723_v57 = vld [vmem:[%s2365_s1 + $0x320] ss:$8 sps:$4 sm:$0xff]   ;;  %v1731_v58 = vld [vmem:[%s2365_s1 + $0x334] ss:$8 sps:$4 sm:$0xff]   ;;  %v1729_v59 = vld [vmem:[%s2365_s1 + $0x330] ss:$8 sps:$4 sm:$0xff]  }
  0x6e   :  { %1493 = vmatprep.subr.bf16.mxu1 %v1764_v40  ;;  %v1737_v60 = vld [vmem:[%s2365_s1 + $0x344] ss:$8 sps:$4 sm:$0xff]   ;;  %v1735_v61 = vld [vmem:[%s2365_s1 + $0x340] ss:$8 sps:$4 sm:$0xff]   ;;  %v1743_v62 = vld [vmem:[%s2365_s1 + $0x354] ss:$8 sps:$4 sm:$0xff]  }
  0x6f   :  { %852 = vmatpush1.bf16.msra.mxu0 %v1679_v39  ;;  %v1741_v63 = vld [vmem:[%s2365_s1 + $0x350] ss:$8 sps:$4 sm:$0xff]   ;;  %v1749_v0 = vld [vmem:[%s2365_s1 + $0x364] ss:$8 sps:$4 sm:$0xff]   ;;  %v1747_v1 = vld [vmem:[%s2365_s1 + $0x360] ss:$8 sps:$4 sm:$0xff]  }
  0x70   :  { %853 = vmatprep.subr.bf16.mxu0 %v1687_v41  ;;  %v1754_v2 = vld [vmem:[%s2365_s1 + $0x374] ss:$8 sps:$4 sm:$0xff]   ;;  %v1752_v3 = vld [vmem:[%s2365_s1 + $0x370] ss:$8 sps:$4 sm:$0xff]   ;;  %v154_v18 = vsub.s32 0, %v153_v17  ;;  %v158_v20 = vsub.s32 1, %v153_v17 }
  0x71   :  { %1494 = vmatpush3.bf16.msra.mxu1 %v1765_v42  ;;  %v1755_v4 = vld [vmem:[%s2364_s0 + $0x18] ss:$0 sps:$4 sm:$0xff]   ;;  %v1768_v7 = vld [vmem:[%s2367_s3 + $0x70] sm:$0xff]   ;;  %v150_v19 = vld [vmem:[%s2366_s2] sm:$0x3] }
  0x72   :  { %1495 = vmatprep.subr.bf16.mxu1 %v1766_v5  ;;  %v1769_v8 = vld [vmem:[%s2367_s3 + $0x30] sm:$0xff]   ;;  %v1770_v9 = vld [vmem:[%s2367_s3 + $0x78] sm:$0xff]   ;;  %v155_v21 = vrot.slane %v150_v19, %v154_v18  ;;  %v159_v22 = vrot.slane %v150_v19, %v158_v20  ;;  %v1772_v34 = vld [vmem:[%s2369_s5] sm:$0xff]  }
  0x73   :  { %854 = vmatpush1.bf16.msra.mxu0 %v1685_v43  ;;  %v1771_v10 = vld [vmem:[%s2367_s3 + $0x38] sm:$0xff]   ;;  %v1773_v36 = vld [vmem:[%s2369_s5 + $0x8] sm:$0xff]   ;;  %v1774_v37 = vld [vmem:[%s2369_s5 + $0x10] sm:$0xff]  }
  0x74   :  { %855 = vmatprep.subr.bf16.mxu0 %v1693_v44  ;;  %v1775_v38 = vld [vmem:[%s2369_s5 + $0x18] sm:$0xff]   ;;  %v1776_v39 = vld [vmem:[%s2369_s5 + $0x20] sm:$0xff]   ;;  %v1777_v40 = vld [vmem:[%s2369_s5 + $0x28] sm:$0xff]  }
  0x75   :  { %1496 = vmatpush3.bf16.msra.mxu1 %v1767_v6  ;;  %v1778_v41 = vld [vmem:[%s2369_s5 + $0x30] sm:$0xff]   ;;  %v1779_v42 = vld [vmem:[%s2369_s5 + $0x38] sm:$0xff]   ;;  %v1450_v44 = vld [vmem:[%s2368_s4] ss:$0 sm:$0xff] }
  0x76   :  { %1497 = vmatprep.subr.bf16.mxu1 %v1768_v7 }
  0x77   :  { %856 = vmatpush1.bf16.msra.mxu0 %v1691_v45 }
  0x78   :  { %857 = vmatprep.subr.bf16.mxu0 %v1699_v46 }
  0x79   :  { %1498 = vmatpush3.bf16.msra.mxu1 %v1769_v8 }
  0x7a   :  { %1499 = vmatprep.subr.bf16.mxu1 %v1770_v9 }
  0x7b   :  { %858 = vmatpush1.bf16.msra.mxu0 %v1697_v47 }
  0x7c   :  { %859 = vmatprep.subr.bf16.mxu0 %v1705_v48 }
  0x7d   :  { %1500 = vmatpush3.bf16.msra.mxu1 %v1771_v10 }
  0x7e   :  { %1525 = vmatprep.subr.bf16.mxu1 %v1813_v11 }
  0x7f   :  { %860 = vmatpush1.bf16.msra.mxu0 %v1703_v49 }
  0x80   :  { %870 = vmatprep.subr.bf16.mxu0 %v1713_v50 }
  0x82   :  { %862 = vmatmul.mubr.bf16.vlgmr.msra.gmra.mrb[0].mxu0 %v1335_v51  ;;  %v1780_v51 = vld [vmem:[%s2371_s7] sm:$0xff]  }
  0x83   :  { %871 = vmatpush1.bf16.msra.mxu0 %v1711_v52  ;;  %902 = vmatprep.mubr.bf16.mxu0 %v1812_v56  ;;  %v1783_v56 = vld [vmem:[%s2371_s7 + $0x18] sm:$0xff]  }
  0x84   :  { %872 = vmatprep.subr.bf16.mxu0 %v1719_v54  ;;  %v1781_v54 = vld [vmem:[%s2371_s7 + $0x8] sm:$0xff]  }
  0x87   :  { %873 = vmatpush1.bf16.msra.mxu0 %v1717_v55  ;;  %v1782_v55 = vld [vmem:[%s2371_s7 + $0x10] sm:$0xff]  }
  0x88   :  { %874 = vmatprep.subr.bf16.mxu0 %v1725_v53  ;;  %v1784_v53 = vld [vmem:[%s2371_s7 + $0x20] sm:$0xff]  }
  0x8b   :  { %875 = vmatpush1.bf16.msra.mxu0 %v1723_v57  ;;  %v1785_v57 = vld [vmem:[%s2371_s7 + $0x28] sm:$0xff]  }
  0x8c   :  { %876 = vmatprep.subr.bf16.mxu0 %v1731_v58  ;;  %v1786_v58 = vld [vmem:[%s2371_s7 + $0x30] sm:$0xff]  }
  0x8f   :  { %877 = vmatpush1.bf16.msra.mxu0 %v1729_v59  ;;  %v1787_v59 = vld [vmem:[%s2371_s7 + $0x38] sm:$0xff]  }
  0x90   :  { %878 = vmatprep.subr.bf16.mxu0 %v1737_v60  ;;  %v1467_v60 = vld [vmem:[%s2370_s6] ss:$0 sm:$0xff]  ;;  %s1788_s6 = scalar_lea.vmem %s1324_s10, 128 }
  0x91   :  { %p1789_p0 = scmp.ne.s32.totalorder %s1324_s10, %s1788_s6  ;;  %p1794_p2 = scmp.lt.s32.totalorder %s1788_s6, %s1788_s6 }
  0x93   :  { %879 = vmatpush1.bf16.msra.mxu0 %v1735_v61  ;;  %p1795_p3 = por %p1794_p2, %p1793_p1 }
  0x94   :  { %880 = vmatprep.subr.bf16.mxu0 %v1743_v62 }
  0x95   :  { %p1796_p4 = pnand %p1795_p3, %p1789_p0 }
  0x97   :  { %881 = vmatpush1.bf16.msra.mxu0 %v1741_v63 }
  0x98   :  { %882 = vmatprep.subr.bf16.mxu0 %v1749_v0 }
  0x9b   :  { %883 = vmatpush1.bf16.msra.mxu0 %v1747_v1 }
  0x9c   :  { %884 = vmatprep.subr.bf16.mxu0 %v1754_v2 }
  0x9f   :  { %885 = vmatpush1.bf16.msra.mxu0 %v1752_v3 }
  0xa2   :  { %903 = vmatmul.mubr.bf16.vlgmr.msra.gmra.mrb[0].mxu0 %v1755_v4  ;;  %v1476_v4 = vld [vmem:[%s2372_s8] ss:$0 sm:$0xff] }
 0x11c   :  { %v781_v12 = vpop.f32.mrb[0].mxu1 }
 0x11d   :  { %v783_v13 = vpop.f32.mrb[1].mxu1  ;;  %v782_v23 = vadd.f32 %v781_v12, %v155_v21 }
 0x11e   :  { %v785_v14 = vpop.f32.mrb[2].mxu1  ;;  %v784_v24 = vadd.f32 %v783_v13, %v159_v22 }
 0x11f   :  { %v786_v15 = vpop.f32.mrb[3].mxu1 }
 0x175   :  { %v904_v25 = vpop.f32.mrb[0].mxu0 }
 0x176   :  { %v1566_v26 = vadd.f32 %v904_v25, %v782_v23  ;;  %v906_v27 = vpop.f32.mrb[1].mxu0 }
 0x177   :  { %v1568_v28 = vadd.f32 %v906_v27, %v784_v24  ;;  %v908_v29 = vpop.f32.mrb[2].mxu0 }
 0x178   :  { %v911_v30 = vmax.f32 %v1566_v26, 0.0  ;;  %v909_v31 = vpop.f32.mrb[3].mxu0 }
 0x179   :  { %v912_v32 = vmax.f32 %v1568_v28, 0.0 }
 0x17a   :  { %v913_v35 = vpack.c.bf16 %v911_v30, %v911_v30 }
 0x17b   :  { %v914_v33 = vpack.c.bf16 %v912_v32, %v912_v32 }
 0x17d   :  { %1082 = vmatprep.mubr.bf16.mxu1 %v914_v33 }
 0x17e   :  { %1083 = vmatmul.mubr.bf16.vlgmr.msra.gmra.mrb[4].mxu1 %v913_v35 }
 0x17f   :  { %1526 = vmatpush3.bf16.msra.mxu1 %v1772_v34  ;;  %1541 = vmatprep.mubr.msk.bf16.mxu1 %vm1814_vm0, %v1813_v11 }
 0x180   :  { %1527 = vmatprep.subr.bf16.mxu1 %v1813_v11 }
 0x183   :  { %1528 = vmatpush3.bf16.msra.mxu1 %v1773_v36 }
 0x184   :  { %1529 = vmatprep.subr.bf16.mxu1 %v1813_v11 }
 0x187   :  { %1530 = vmatpush3.bf16.msra.mxu1 %v1774_v37 }
 0x188   :  { %1531 = vmatprep.subr.bf16.mxu1 %v1813_v11 }
 0x18b   :  { %1532 = vmatpush3.bf16.msra.mxu1 %v1775_v38 }
 0x18c   :  { %1533 = vmatprep.subr.bf16.mxu1 %v1813_v11 }
 0x18f   :  { %1534 = vmatpush3.bf16.msra.mxu1 %v1776_v39 }
 0x190   :  { %1535 = vmatprep.subr.bf16.mxu1 %v1813_v11 }
 0x193   :  { %1536 = vmatpush3.bf16.msra.mxu1 %v1777_v40 }
 0x194   :  { %1537 = vmatprep.subr.bf16.mxu1 %v1813_v11 }
 0x197   :  { %1538 = vmatpush3.bf16.msra.mxu1 %v1778_v41 }
 0x198   :  { %1539 = vmatprep.subr.bf16.mxu1 %v1813_v11 }
 0x19b   :  { %1540 = vmatpush3.bf16.msra.mxu1 %v1779_v42 }
 0x19c   :  { %1545 = vmatprep.subr.bf16.mxu1 %v1813_v11 }
 0x251   :  { %v1501_v43 = vpop.f32.mrb[4].mxu1 }
 0x252   :  { %v1502_v45 = vpop.f32.mrb[5].mxu1 }
 0x253   :  { %v1503_v46 = vadd.f32 %v1502_v45, %v1501_v43  ;;  %v1504_v47 = vpop.f32.mrb[6].mxu1 }
 0x254   :  { %v1505_v48 = vpop.f32.mrb[7].mxu1 }
 0x255   :  { %v1085_v49 = vadd.f32 %v1503_v46, %v1450_v44 }
 0x257   :  { %v1090_v50 = vmax.f32 %v1085_v49, 0.0 }
 0x259   :  { %v1091_v52 = vpack.c.bf16 %v1090_v50, %v1090_v50 }
 0x25b   :  { %1542 = vmatmul.mubr.bf16.vlgmr.msra.gmra.mrb[8].mxu1 %v1091_v52 }
 0x25c   :  { %1546 = vmatpush3.bf16.msra.mxu1 %v1780_v51  ;;  %1561 = vmatprep.mubr.msk.bf16.mxu1 %vm1814_vm0, %v1813_v11 }
 0x25d   :  { %1547 = vmatprep.subr.bf16.mxu1 %v1813_v11 }
 0x260   :  { %1548 = vmatpush3.bf16.msra.mxu1 %v1781_v54 }
 0x261   :  { %1549 = vmatprep.subr.bf16.mxu1 %v1813_v11 }
 0x264   :  { %1550 = vmatpush3.bf16.msra.mxu1 %v1782_v55 }
 0x265   :  { %1551 = vmatprep.subr.bf16.mxu1 %v1813_v11 }
 0x268   :  { %1552 = vmatpush3.bf16.msra.mxu1 %v1783_v56 }
 0x269   :  { %1553 = vmatprep.subr.bf16.mxu1 %v1813_v11 }
 0x26c   :  { %1554 = vmatpush3.bf16.msra.mxu1 %v1784_v53 }
 0x26d   :  { %1555 = vmatprep.subr.bf16.mxu1 %v1813_v11 }
 0x270   :  { %1556 = vmatpush3.bf16.msra.mxu1 %v1785_v57 }
 0x271   :  { %1557 = vmatprep.subr.bf16.mxu1 %v1813_v11 }
 0x274   :  { %1558 = vmatpush3.bf16.msra.mxu1 %v1786_v58 }
 0x275   :  { %1559 = vmatprep.subr.bf16.mxu1 %v1813_v11 }
 0x278   :  { %1560 = vmatpush3.bf16.msra.mxu1 %v1787_v59 }
 0x32e   :  { %v1197_v61 = vpop.f32.mrb[8].mxu1 }
 0x32f   :  { %v1198_v62 = vadd.f32 %v1467_v60, %v1197_v61  ;;  %v1543_v63 = vpop.f32.mrb[9].mxu1 }
 0x330   :  { %v1200_v0 = vpop.f32.mrb[10].mxu1 }
 0x331   :  { %v1203_v1 = vmax.f32 %v1198_v62, 0.0  ;;  %v1544_v2 = vpop.f32.mrb[11].mxu1 }
 0x333   :  { %v1204_v3 = vpack.c.bf16 %v1203_v1, %v1203_v1 }
 0x335   :  { %1562 = vmatmul.mubr.bf16.vlgmr.msra.gmra.mrb[12].mxu1 %v1204_v3 }
 0x408   :  { %v1310_v5 = vpop.f32.mrb[12].mxu1 }
 0x409   :  { %v1311_v6 = vadd.f32 %v1476_v4, %v1310_v5  ;;  %v1563_v7 = vpop.f32.mrb[13].mxu1 }
 0x40a   :  { %v1313_v8 = vpop.f32.mrb[14].mxu1 }
 0x40b   :  { %1316 = vst [vmem:[#allocation2] sm:$0xff] %v1311_v6  ;;  %v1564_v9 = vpop.f32.mrb[15].mxu1 }
 0x40c   :  { %1799 = shalt.err (!%p1796_p4)
}
 0x40d   :  { %s1800_s8 = scalar_lea.hbm %s2373_s9, 128 }
 0x40e   :  { %p1801_p5 = scmp.ne.s32.totalorder %s2373_s9, %s1800_s8  ;;  %p1804_p6 = scmp.lt.u32.totalorder %s1800_s8, %s2373_s9 }
 0x410   :  { %p1806_p7 = pnand %p1804_p6, %p1801_p5 }
 0x412   :  { %1809 = shalt.err (!%p1806_p7)
}
 0x413   :  { %1326 = dma.vmem_to_hbm [thread:$0]  %s1324_s10, 128, %s2373_s9, [#allocation3]  }
 0x414   :  { %1810 = dma.done.wait [#allocation3], 128  }
 0x415   :  { %1811 = vsyncadd [#allocation3], 4294967168 }
 0x416   :  { %1330 = vsyncpa [#allocation3], 1 }

</bundles_post_ra>
